<compile_context>
chip_gen: v5e
topology: v5e:2x2
jax: 0.10.0
libtpu: 0.0.40
codegen_flags: <defaults>
</compile_context>

<pallas_src>
import functools

import jax
import jax.numpy as jnp
from jax.experimental import pallas as pl
from jax.experimental.pallas import tpu as pltpu

# ---- model hyper-parameters (small, consistent with the module) -------------
VOCAB = 50
EMB_DIM = 32             # embedding_dim
N_FILTERS = 16           # n_filters
FILTER_SIZES = (2, 3, 4)
OUTPUT_DIM = 5           # output_dim
SEQ_LEN = 16
BATCH = 16               # total batch fed to the wrapper
BATCH_TILE = 8           # sequences per grid step -> 128 MXU rows (v6e/v7x: use 16)
DROPOUT = 0.5            # inference -> identity

LANES = 128                                   # one vreg-aligned lane block per conv tap
MAX_FS = max(FILTER_SIZES)
POOL_DIM = len(FILTER_SIZES) * N_FILTERS      # 48 concatenated pooled features
PAD_ROWS = 8                                  # per-tile seq padding (>= MAX_FS-1, 8-aligned)


def _textcnn_kernel(ids_ref, wfused_ref, cb_ref, fcw_ref, fcb_ref, out_ref, *,
                    batch_tile, seq_len, n_filters, filter_sizes, vocab, pad_rows):
    """Fused one-hot embedding+conv matmul, aligned shifted-sum, masked max, FC."""
    bs = batch_tile * seq_len
    bsp = bs + pad_rows
    max_fs = max(filter_sizes)

    # --- MXU push #1: one-hot ids @ W_fused (embedding already folded in) ----
    ids = ids_ref[...]                                               # [bsp, 1] int32
    vocab_iota = jax.lax.broadcasted_iota(jnp.int32, (bsp, vocab), 1)
    onehot = (ids == vocab_iota).astype(jnp.float32)                 # pad rows (id=VOCAB) -> all-zero
    taps = jnp.dot(onehot, wfused_ref[...],
                   preferred_element_type=jnp.float32)               # [bsp, max_fs*128]

    # --- shifted-sum conv: tap k lives in 128-aligned lane block k -----------
    # acc[r, gi*F+f] = sum_k taps[r+k, k*128 + gi*F + f]; rows past each
    # filter's valid length are garbage/partial and get masked below.
    acc = taps[0:bs, 0:LANES]
    for k in range(1, max_fs):
        acc = acc + taps[k:k + bs, k * LANES:(k + 1) * LANES]
    acc3 = acc.reshape(batch_tile, seq_len, LANES)                   # [Bt, S, 128]

    # --- single masked max-over-time (per-lane valid length 15/14/13) -------
    t_idx = jax.lax.broadcasted_iota(jnp.int32, (batch_tile, seq_len, LANES), 1)
    lane_idx = jax.lax.broadcasted_iota(jnp.int32, (batch_tile, seq_len, LANES), 2)
    valid_len = jnp.full((batch_tile, seq_len, LANES),
                         seq_len - filter_sizes[-1] + 1, jnp.int32)
    for gi in range(len(filter_sizes) - 2, -1, -1):
        valid_len = jnp.where(lane_idx < (gi + 1) * n_filters,
                              seq_len - filter_sizes[gi] + 1, valid_len)
    neg = jnp.float32(-1e30)
    pooled = jnp.max(jnp.where(t_idx < valid_len, acc3, neg), axis=1)  # [Bt, 128]

    # exact identity: max_t ReLU(s_t + b) == ReLU(max_t s_t + b); pad lanes -> 0
    cat = jnp.maximum(pooled + cb_ref[...], 0.0)                     # [Bt, 128]

    # --- MXU push #2: fused FC over the lane-contiguous pooled slab ----------
    out_ref[...] = jnp.dot(cat, fcw_ref[...],
                           preferred_element_type=jnp.float32) + fcb_ref[...]


def textcnn_forward(x, params, *, batch_tile=BATCH_TILE):
    """Mirrors TextCNN.forward(x) with x = (text, lengths); text: [seq_len, batch]."""
    text, _ = x
    seq_len, batch = text.shape
    assert seq_len == SEQ_LEN and batch % batch_tile == 0
    assert PAD_ROWS >= MAX_FS - 1
    n_tiles = batch // batch_tile
    bs_tile = batch_tile * SEQ_LEN
    bsp = bs_tile + PAD_ROWS

    # permute(1, 0) + row-major flatten per batch tile, then pad each tile with
    # out-of-vocab ids (=> all-zero one-hot rows) so in-kernel tap shifts stay in-bounds.
    ids = jnp.transpose(text, (1, 0)).reshape(n_tiles, bs_tile)
    ids = jnp.pad(ids, ((0, 0), (0, PAD_ROWS)), constant_values=VOCAB)
    ids = ids.reshape(n_tiles * bsp, 1).astype(jnp.int32)

    kernel = functools.partial(
        _textcnn_kernel,
        batch_tile=batch_tile, seq_len=SEQ_LEN, n_filters=N_FILTERS,
        filter_sizes=FILTER_SIZES, vocab=VOCAB, pad_rows=PAD_ROWS)

    out = pl.pallas_call(
        kernel,
        out_shape=jax.ShapeDtypeStruct((batch, LANES), jnp.float32),
        grid=(n_tiles,),
        in_specs=[
            pl.BlockSpec((bsp, 1), lambda i: (i, 0)),                 # per-tile token ids
            pl.BlockSpec((VOCAB, MAX_FS * LANES), lambda i: (0, 0)),  # fused emb+conv weight (resident)
            pl.BlockSpec((1, LANES), lambda i: (0, 0)),               # conv bias (padded)
            pl.BlockSpec((LANES, LANES), lambda i: (0, 0)),           # FC weight (padded)
            pl.BlockSpec((1, LANES), lambda i: (0, 0)),               # FC bias (padded)
        ],
        out_specs=pl.BlockSpec((batch_tile, LANES), lambda i: (i, 0)),
        compiler_params=pltpu.CompilerParams(
            dimension_semantics=("parallel",)),                       # v7x: 2 TCs split the grid
    )(ids, params["w_fused"], params["conv_b_all"],
      params["fc_w_pad"], params["fc_b_pad"])
    return out[:, :OUTPUT_DIM]


def init_params(key):
    keys = jax.random.split(key, 3 + 2 * len(FILTER_SIZES))
    params = {}
    # nn.Embedding.from_pretrained -> pretrained_embeddings [VOCAB, EMB_DIM]
    params["embedding"] = jax.random.normal(keys[0], (VOCAB, EMB_DIM), jnp.float32) * 0.1

    conv_w, conv_b = [], []
    for i, fs in enumerate(FILTER_SIZES):
        # PyTorch Conv1d weight [n_filters, emb_dim, fs] -> kernel layout [fs, emb_dim, n_filters]
        w_torch = jax.random.normal(keys[1 + 2 * i],
                                    (N_FILTERS, EMB_DIM, fs), jnp.float32) * 0.05
        b = jax.random.normal(keys[2 + 2 * i], (1, N_FILTERS), jnp.float32) * 0.05
        conv_w.append(jnp.transpose(w_torch, (2, 1, 0)))
        conv_b.append(b)
    params["conv_w"] = conv_w          # kept for the pure-JAX reference
    params["conv_b"] = conv_b

    # Tap-major, 128-lane-aligned im2col weight: tap k occupies lanes
    # [k*128, k*128 + 48) ordered (fs=2 filters, fs=3 filters, fs=4 filters);
    # taps that do not exist for a filter size are zero columns.
    w_all = jnp.zeros((EMB_DIM, MAX_FS * LANES), jnp.float32)
    for k in range(MAX_FS):
        for gi, fs in enumerate(FILTER_SIZES):
            if k < fs:
                col = k * LANES + gi * N_FILTERS
                w_all = w_all.at[:, col:col + N_FILTERS].set(conv_w[gi][k])
    # Fuse the embedding: onehot @ (emb @ W) == (onehot @ emb) @ W (exact row select).
    params["w_fused"] = jnp.matmul(params["embedding"], w_all,
                                   precision=jax.lax.Precision.HIGHEST)  # [VOCAB, 4*128]

    cb = jnp.zeros((1, LANES), jnp.float32)
    params["conv_b_all"] = cb.at[:, :POOL_DIM].set(jnp.concatenate(conv_b, axis=1))

    # PyTorch Linear weight [OUTPUT_DIM, 3*N_FILTERS] -> kernel layout [48, OUTPUT_DIM]
    fc_w_torch = jax.random.normal(keys[-2], (OUTPUT_DIM, POOL_DIM), jnp.float32) * 0.05
    params["fc_w"] = jnp.transpose(fc_w_torch, (1, 0))
    params["fc_b"] = jax.random.normal(keys[-1], (1, OUTPUT_DIM), jnp.float32) * 0.05
    # Lane-dense padded FC (zero rows for pad lanes, zero cols past OUTPUT_DIM).
    fcw = jnp.zeros((LANES, LANES), jnp.float32)
    params["fc_w_pad"] = fcw.at[:POOL_DIM, :OUTPUT_DIM].set(params["fc_w"])
    fcb = jnp.zeros((1, LANES), jnp.float32)
    params["fc_b_pad"] = fcb.at[:, :OUTPUT_DIM].set(params["fc_b"])
    return params


def reference_forward(x, params):
    """Pure-JAX reference of the original module's math for a correctness check."""
    text, _ = x
    text = jnp.transpose(text, (1, 0))
    emb = params["embedding"][text]              # [B, S, E]
    pooled = []
    for (w, b), fs in zip(zip(params["conv_w"], params["conv_b"]), FILTER_SIZES):
        L = SEQ_LEN - fs + 1
        outs = []
        for t in range(L):
            s = sum(emb[:, t + k, :] @ w[k] for k in range(fs)) + b
            outs.append(jnp.maximum(s, 0.0))
        pooled.append(jnp.max(jnp.stack(outs, axis=1), axis=1))
    cat = jnp.concatenate(pooled, axis=1)        # dropout = identity (eval)
    return cat @ params["fc_w"] + params["fc_b"]


if __name__ == "__main__":
    key = jax.random.PRNGKey(0)
    k_param, k_text = jax.random.split(key)
    params = init_params(k_param)

    # text: [seq_len, batch] token ids (as the module expects before permute(1,0)).
    # NOTE: out-of-range ids would silently map to a zero embedding row (one-hot path).
    text = jax.random.randint(k_text, (SEQ_LEN, BATCH), 0, VOCAB, dtype=jnp.int32)
    lengths = jnp.full((BATCH,), SEQ_LEN, dtype=jnp.int32)   # unused, mirrors (text, _)

    out = textcnn_forward((text, lengths), params)
    out = jax.block_until_ready(out)

    ref = reference_forward((text, lengths), params)
    assert out.shape == (BATCH, OUTPUT_DIM)
    # Tolerance covers matmul-engine precision differences only; any packing/mask
    # bug would show up as O(1)-relative errors.
    assert jnp.allclose(out, ref, atol=1e-3, rtol=1e-3)
    print("KERNEL_OK")
</pallas_src>

<mosaic_0001>
module attributes {stable_mosaic.version = 11 : i64} {
  func.func @_textcnn_kernel(%arg0: i32, %arg1: memref<136x1xi32, #tpu.memory_space<vmem>>, %arg2: memref<50x512xf32, #tpu.memory_space<vmem>>, %arg3: memref<1x128xf32, #tpu.memory_space<vmem>>, %arg4: memref<128x128xf32, #tpu.memory_space<vmem>>, %arg5: memref<1x128xf32, #tpu.memory_space<vmem>>, %arg6: memref<8x128xf32, #tpu.memory_space<vmem>>) attributes {dimension_semantics = [#tpu.dimension_semantics<parallel>], iteration_bounds = array<i64: 2>, scalar_prefetch = 0 : i64, scratch_operands = 0 : i64, tpu.core_type = #tpu.core_type<tc>, window_params = [{transform_indices = @transform_0, window_bounds = array<i64: 136, 1>}, {pipeline_mode = #tpu.pipeline_mode<synchronous>, transform_indices = @transform_1, window_bounds = array<i64: 50, 512>}, {pipeline_mode = #tpu.pipeline_mode<synchronous>, transform_indices = @transform_2, window_bounds = array<i64: 1, 128>}, {pipeline_mode = #tpu.pipeline_mode<synchronous>, transform_indices = @transform_3, window_bounds = array<i64: 128, 128>}, {pipeline_mode = #tpu.pipeline_mode<synchronous>, transform_indices = @transform_4, window_bounds = array<i64: 1, 128>}, {transform_indices = @transform_5, window_bounds = array<i64: 8, 128>}]} {
    %c0 = arith.constant 0 : index
    %c0_0 = arith.constant 0 : index
    %0 = vector.load %arg1[%c0, %c0_0] : memref<136x1xi32, #tpu.memory_space<vmem>>, vector<136x1xi32>
    %1 = tpu.iota {dimensions = array<i32: 1>} : vector<136x50xi32>
    %2 = vector.broadcast %0 : vector<136x1xi32> to vector<136x50xi32>
    %3 = arith.cmpi eq, %2, %1 : vector<136x50xi32>
    %4 = arith.extui %3 : vector<136x50xi1> to vector<136x50xi32>
    %5 = arith.sitofp %4 : vector<136x50xi32> to vector<136x50xf32>
    %c0_1 = arith.constant 0 : index
    %c0_2 = arith.constant 0 : index
    %6 = vector.load %arg2[%c0_1, %c0_2] : memref<50x512xf32, #tpu.memory_space<vmem>>, vector<50x512xf32>
    %cst = arith.constant dense<0.000000e+00> : vector<136x512xf32>
    %7 = tpu.matmul %5, %6, %cst {dimension_numbers = #tpu.dot_dimension_numbers<[1], [0], [0], [1], [0, 0, 1, 1], [], []>} : vector<136x50xf32>, vector<50x512xf32>, vector<136x512xf32> -> vector<136x512xf32>
    %8 = vector.extract_strided_slice %7 {offsets = [0, 0], sizes = [128, 128], strides = [1, 1]} : vector<136x512xf32> to vector<128x128xf32>
    %9 = vector.extract_strided_slice %7 {offsets = [1, 128], sizes = [128, 128], strides = [1, 1]} : vector<136x512xf32> to vector<128x128xf32>
    %10 = arith.addf %8, %9 : vector<128x128xf32>
    %11 = vector.extract_strided_slice %7 {offsets = [2, 256], sizes = [128, 128], strides = [1, 1]} : vector<136x512xf32> to vector<128x128xf32>
    %12 = arith.addf %10, %11 : vector<128x128xf32>
    %13 = vector.extract_strided_slice %7 {offsets = [3, 384], sizes = [128, 128], strides = [1, 1]} : vector<136x512xf32> to vector<128x128xf32>
    %14 = arith.addf %12, %13 : vector<128x128xf32>
    %15 = vector.shape_cast %14 : vector<128x128xf32> to vector<8x16x128xf32>
    %16 = tpu.iota {dimensions = array<i32: 1>} : vector<8x16x128xi32>
    %17 = tpu.iota {dimensions = array<i32: 2>} : vector<8x16x128xi32>
    %c13_i32 = arith.constant 13 : i32
    %18 = vector.broadcast %c13_i32 : i32 to vector<8x16x128xi32>
    %c32_i32 = arith.constant 32 : i32
    %19 = vector.broadcast %c32_i32 : i32 to vector<8x16x128xi32>
    %20 = arith.cmpi slt, %17, %19 : vector<8x16x128xi32>
    %c14_i32 = arith.constant 14 : i32
    %21 = vector.broadcast %c14_i32 : i32 to vector<8x16x128xi32>
    %22 = arith.select %20, %21, %18 : vector<8x16x128xi1>, vector<8x16x128xi32>
    %c16_i32 = arith.constant 16 : i32
    %23 = vector.broadcast %c16_i32 : i32 to vector<8x16x128xi32>
    %24 = arith.cmpi slt, %17, %23 : vector<8x16x128xi32>
    %c15_i32 = arith.constant 15 : i32
    %25 = vector.broadcast %c15_i32 : i32 to vector<8x16x128xi32>
    %26 = arith.select %24, %25, %22 : vector<8x16x128xi1>, vector<8x16x128xi32>
    %27 = arith.cmpi slt, %16, %26 : vector<8x16x128xi32>
    %cst_3 = arith.constant -1.000000e+30 : f32
    %28 = vector.broadcast %cst_3 : f32 to vector<8x16x128xf32>
    %29 = arith.select %27, %15, %28 : vector<8x16x128xi1>, vector<8x16x128xf32>
    %cst_4 = arith.constant dense<0xFF800000> : vector<8x128xf32>
    %30 = vector.multi_reduction <maximumf>, %29, %cst_4 [1] : vector<8x16x128xf32> to vector<8x128xf32>
    %c0_5 = arith.constant 0 : index
    %c0_6 = arith.constant 0 : index
    %31 = vector.load %arg3[%c0_5, %c0_6] : memref<1x128xf32, #tpu.memory_space<vmem>>, vector<1x128xf32>
    %32 = vector.broadcast %31 : vector<1x128xf32> to vector<8x128xf32>
    %33 = arith.addf %30, %32 : vector<8x128xf32>
    %cst_7 = arith.constant 0.000000e+00 : f32
    %34 = vector.broadcast %cst_7 : f32 to vector<8x128xf32>
    %35 = arith.maximumf %33, %34 : vector<8x128xf32>
    %c0_8 = arith.constant 0 : index
    %c0_9 = arith.constant 0 : index
    %36 = vector.load %arg4[%c0_8, %c0_9] : memref<128x128xf32, #tpu.memory_space<vmem>>, vector<128x128xf32>
    %cst_10 = arith.constant dense<0.000000e+00> : vector<8x128xf32>
    %37 = tpu.matmul %35, %36, %cst_10 {dimension_numbers = #tpu.dot_dimension_numbers<[1], [0], [0], [1], [0, 0, 1, 1], [], []>} : vector<8x128xf32>, vector<128x128xf32>, vector<8x128xf32> -> vector<8x128xf32>
    %c0_11 = arith.constant 0 : index
    %c0_12 = arith.constant 0 : index
    %38 = vector.load %arg5[%c0_11, %c0_12] : memref<1x128xf32, #tpu.memory_space<vmem>>, vector<1x128xf32>
    %39 = vector.broadcast %38 : vector<1x128xf32> to vector<8x128xf32>
    %40 = arith.addf %37, %39 : vector<8x128xf32>
    %c0_13 = arith.constant 0 : index
    %c0_14 = arith.constant 0 : index
    %41 = vector.load %arg6[%c0_13, %c0_14] : memref<8x128xf32, #tpu.memory_space<vmem>>, vector<8x128xf32>
    tpu.vector_store %arg6[%c0_13, %c0_14], %40 {strides = array<i32>} : memref<8x128xf32, #tpu.memory_space<vmem>>, vector<8x128xf32>,
    return
  }
  func.func @transform_0(%arg0: i32) -> (i32, i32) {
    %c0_i32 = arith.constant 0 : i32
    %c0_i32_0 = arith.constant 0 : i32
    return %arg0, %c0_i32 : i32, i32
  }
  func.func @transform_1(%arg0: i32) -> (i32, i32) {
    %c0_i32 = arith.constant 0 : i32
    %c0_i32_0 = arith.constant 0 : i32
    %c0_i32_1 = arith.constant 0 : i32
    return %c0_i32, %c0_i32_0 : i32, i32
  }
  func.func @transform_2(%arg0: i32) -> (i32, i32) {
    %c0_i32 = arith.constant 0 : i32
    %c0_i32_0 = arith.constant 0 : i32
    %c0_i32_1 = arith.constant 0 : i32
    return %c0_i32, %c0_i32_0 : i32, i32
  }
  func.func @transform_3(%arg0: i32) -> (i32, i32) {
    %c0_i32 = arith.constant 0 : i32
    %c0_i32_0 = arith.constant 0 : i32
    %c0_i32_1 = arith.constant 0 : i32
    return %c0_i32, %c0_i32_0 : i32, i32
  }
  func.func @transform_4(%arg0: i32) -> (i32, i32) {
    %c0_i32 = arith.constant 0 : i32
    %c0_i32_0 = arith.constant 0 : i32
    %c0_i32_1 = arith.constant 0 : i32
    return %c0_i32, %c0_i32_0 : i32, i32
  }
  func.func @transform_5(%arg0: i32) -> (i32, i32) {
    %c0_i32 = arith.constant 0 : i32
    %c0_i32_0 = arith.constant 0 : i32
    return %arg0, %c0_i32 : i32, i32
  }
}

</mosaic_0001>

<bundles_post_ra>
// kernel: tpu_custom_call.1
= control target key start
LH: loop header
LB: loop body
LE: loop exit
PB: predicated region body
PF: predicated region fallthrough
CT: control target
= control target key end

     0   :  { %10 = vsyncpa [#allocation3], 0  ;;  %s1948_s0 = inlined_call_operand.vmem [shape: s32[272,1], index: 0, kind: input, shape index: {}]   ;;  %s1949_s1 = inlined_call_operand.vmem [shape: f32[50,512], index: 1, kind: input, shape index: {}]   ;;  %s1950_s2 = inlined_call_operand.vmem [shape: f32[1,128], index: 2, kind: input, shape index: {}]   ;;  %s1951_s3 = inlined_call_operand.hbm [shape: f32[128,128], index: 3, kind: input, shape index: {}]   ;;  %s1952_s4 = inlined_call_operand.vmem [shape: f32[1,128], index: 4, kind: input, shape index: {}]   ;;  %s1953_s5 = inlined_call_operand.hbm [shape: f32[16,128], index: 5, kind: output, shape index: {}]  }
   0x1   :  { %11 = vsyncpa [#allocation4], 0 }
   0x2   :  { %13 = vsyncpa [#allocation4 + $0x1], 0  ;;  %s1530_s18 = smov 0   ;;  %s1532_s19 = smov 0  }
   0x3   :  { %s1534_s20 = smov 0   ;;  %s1536_s21 = smov 0  }
   0x4 LB: > { %s1551_s22 = sadd.s32 4294967295, %s1492_s21   ;;  %s1235_s23 = sadd.s32 4294967294, %s1492_s21   ;;  %s1492_s21 = sphi %s1536_s21, %s1961_s21   ;;  %s1488_s20 = sphi %s1534_s20, %s1960_s20   ;;  %s1484_s19 = sphi %s1532_s19, %s1959_s19   ;;  %s1480_s18 = sphi %s1530_s18, %s1958_s18  }
   0x5   : > { %s1555_s24 = sadd.s32 1, %s1492_s21   ;;  %s136_s25 = sadd.s32 1, %s1488_s20 }
   0x6   : > { %s133_s26 = ssub.s32 %s1492_s21, %s1555_s24  ;;  %p146_p0 = scmp.ne.s32.totalorder %s1488_s20, %s1484_s19 }
   0x7   : > { %p134_p1 = scmp.eq.s32.totalorder %s133_s26, 0  ;;  %p147_p2 = scmp.eq.s32.totalorder %s1551_s22, 1 }
   0x8   : > { %p152_p3 = scmp.ne.s32.totalorder %s1484_s19, %s1480_s18  ;;  %p153_p4 = scmp.eq.s32.totalorder %s1235_s23, 1 }
   0x9   : > { %s1566_s27 = scalar_select %p134_p1, %s1488_s20, %s136_s25  }
   0xa   : > { %p1568_p5 = por %p147_p2, %p146_p0  ;;  %p1572_p6 = por %p153_p4, %p152_p3 }
   0xb   : > { %p1236_p7 = scmp.ge.s32.totalorder %s1492_s21, 1  ;;  %p160_p8 = scmp.lt.s32.totalorder %s1492_s21, 3 }
   0xc   : > { %p1350_p9 = scmp.eq.s32.totalorder %s1551_s22, 0  ;;  %s177_s7 = sshll.u32 %s1951_s3, 4  ;;  %s178_s7 = int_to_ptr.hbm [resolvable:$true] %s177_s7 }
   0xd   : > { %p161_p10 = pnand %p1236_p7, %p160_p8  ;;  %s1494_s8 = smov [#allocation2]  }
   0xe   : > { %s179_s9 = sshll.u32 %s1494_s8, 4  ;;  %s1495_s10 = smov 128   ;;  %s180_s9 = int_to_ptr.vmem [resolvable:$true] %s179_s9 }
   0xf   : > { %p1342_p11 = pneg %p161_p10  ;;  %s1496_s11 = smov 8  }
  0x10   : > { %207 = sbr.rel (%p161_p10) target bundleno = 568 (0x238), region = 40 }
  0x11   : > { %p1343_p12 = pnand %p1350_p9, %p1342_p11 }
  0x13   : > { %1345 = dma.hbm_to_vmem [thread:$0]  (!%p1343_p12), %s178_s7, 2048, %s180_s9, [#allocation3], %s1495_s10, %s1495_s10, %s1496_s11  }
  0x15   : > { %1471 = dma.done.wait (%p1350_p9), [#allocation3], 2048  }
  0x16   : > { %1473 = vsyncadd (%p1350_p9), [#allocation3], 4294965248  ;;  %s236_s12 = smul.u32 17, %s1551_s22  ;;  %v1497_v0 = vmov 0   ;;  %v387_v7 = vld [vmem:[%s1949_s1 + $0xc0] sm:$0x3]  ;;  %v259_v46 = vlaneseq }
  0x17   : > { %1392 = vset.pattern.permute.xlu1 %v1497_v0  ;;  %1391 = vset.pattern.permute.xlu0 %v1497_v0  ;;  %vm443_vm0 = vcmask 1041408   ;;  %v388_v8 = vld [vmem:[%s1949_s1 + $0xc8] sm:$0x3]  ;;  %v389_v9 = vld [vmem:[%s1949_s1 + $0xd0] sm:$0x3]  ;;  %v383_v11 = vld [vmem:[%s1949_s1 + $0xa0] sm:$0xff] }
  0x18   : > { %p237_p13 = scmp.lt.s32.totalorder %s236_s12, 33  ;;  %1393 = vset.pattern.permute.xlu2 %v1497_v0  ;;  %1260 = vmatpush.msk.msra.mxu0 %vm443_vm0, %v387_v7  ;;  %v390_v10 = vld [vmem:[%s1949_s1 + $0xd8] sm:$0x3]  ;;  %v384_v12 = vld [vmem:[%s1949_s1 + $0xa8] sm:$0xff]  ;;  %v385_v13 = vld [vmem:[%s1949_s1 + $0xb0] sm:$0xff]  ;;  %v1696_v47 = vand.u32 127, %v259_v46 }
  0x19   : > { %1278 = vmatpush.msk.msra.mxu1 %vm443_vm0, %v388_v8  ;;  %1296 = vmatpush.msk.msra.mxu2 %vm443_vm0, %v389_v9  ;;  %v386_v14 = vld [vmem:[%s1949_s1 + $0xb8] sm:$0xff]  ;;  %v379_v15 = vld [vmem:[%s1949_s1 + $0x80] sm:$0xff]  ;;  %v380_v16 = vld [vmem:[%s1949_s1 + $0x88] sm:$0xff]  ;;  %vm391_vm1 = vcmask 408576   ;;  %v1498_v49 = vmov 0.0   ;;  %s1333_s15 = sshll.u32 %s1551_s22, 3 }
  0x1a   : > { %s1963_s12 = smov (!%p237_p13, %s236_s12), 33  ;;  %1314 = vmatpush.msk.msra.mxu3 %vm443_vm0, %v390_v10  ;;  %466 = vmatpush.msra.mxu0 %v383_v11  ;;  %v381_v17 = vld [vmem:[%s1949_s1 + $0x90] sm:$0xff]  ;;  %v382_v18 = vld [vmem:[%s1949_s1 + $0x98] sm:$0xff]  ;;  %v375_v21 = vld [vmem:[%s1949_s1 + $0x60] sm:$0xff]  ;;  %s1159_s25 = scalar_lea.hbm %s1953_s5, %s1333_s15 }
  0x1b   : > { %s1242_s13 = sshll.u32 %s1963_s12, 3  ;;  %533 = vmatpush.msra.mxu1 %v384_v12  ;;  %601 = vmatpush.msra.mxu2 %v385_v13  ;;  %v376_v22 = vld [vmem:[%s1949_s1 + $0x68] sm:$0xff]  ;;  %v377_v24 = vld [vmem:[%s1949_s1 + $0x70] sm:$0xff]  ;;  %v378_v25 = vld [vmem:[%s1949_s1 + $0x78] sm:$0xff]  ;;  %s1163_s8 = sshll.u32 %s1159_s25, 4  ;;  %s1164_s8 = int_to_ptr.hbm [resolvable:$true] %s1163_s8 }
  0x1c   : > { %s1592_s16 = scalar_lea.vmem %s1948_s0, %s1242_s13  ;;  %669 = vmatpush.msra.mxu3 %v386_v14  ;;  %467 = vmatpush.msra.mxu0 %v379_v15  ;;  %v371_v26 = vld [vmem:[%s1949_s1 + $0x40] sm:$0xff]  ;;  %v372_v27 = vld [vmem:[%s1949_s1 + $0x48] sm:$0xff]  ;;  %v373_v28 = vld [vmem:[%s1949_s1 + $0x50] sm:$0xff]  ;;  %s233_s13 = sand.u32 1, %s1484_s19  }
  0x1d   : > { %v244_v1 = vld [vmem:[%s1592_s16 + $0x10] sm:$0xff]  ;;  %v242_v2 = vld [vmem:[%s1592_s16] sm:$0xff]  ;;  %v245_v4 = vld [vmem:[%s1592_s16 + $0x18] sm:$0xff]  ;;  %534 = vmatpush.msra.mxu1 %v380_v16  ;;  %602 = vmatpush.msra.mxu2 %v381_v17  ;;  %s1241_s14 = sshll.u32 %s233_s13, 3  ;;  %s1149_s9 = scalar_lea.sflag [#allocation4], %s233_s13 }
  0x1e   : > { %268 = vperm.xlu1 %1392, %v244_v1   ;;  %262 = vperm.xlu0 %1391, %v242_v2   ;;  %v246_v3 = vld [vmem:[%s1592_s16 + $0x20] sm:$0xff]  ;;  %v243_v5 = vld [vmem:[%s1592_s16 + $0x8] sm:$0xff]  ;;  %v249_v19 = vld [vmem:[%s1592_s16 + $0x38] sm:$0xff]  ;;  %s235_s6 = scalar_lea.vmem [#allocation5], %s1241_s14  ;;  %s1440_s10 = sshra.s32 %s1164_s8, 4  ;;  %s1441_s10 = int_to_ptr.hbm [resolvable:$true] %s1440_s10 }
  0x1f   : > { %274 = vperm.xlu2 %1393, %v246_v3   ;;  %v247_v6 = vld [vmem:[%s1592_s16 + $0x28] sm:$0xff]  ;;  %v248_v20 = vld [vmem:[%s1592_s16 + $0x30] sm:$0xff]  ;;  %v250_v23 = vld [vmem:[%s1592_s16 + $0x40] sm:$0xff]  ;;  %670 = vmatpush.msra.mxu3 %v382_v18  ;;  %s1161_s7 = sshll.u32 %s235_s6, 4  ;;  %s1442_s22 = scalar_lea.hbm %s1441_s10, 8  ;;  %s1162_s7 = int_to_ptr.vmem [resolvable:$true] %s1161_s7 }
  0x20   : > { %468 = vmatpush.msra.mxu0 %v375_v21  ;;  %535 = vmatpush.msra.mxu1 %v376_v22  ;;  %v374_v29 = vld [vmem:[%s1949_s1 + $0x58] sm:$0xff]  ;;  %v367_v30 = vld [vmem:[%s1949_s1 + $0x20] sm:$0xff]  ;;  %v368_v31 = vld [vmem:[%s1949_s1 + $0x28] sm:$0xff]  ;;  %p1443_p0 = scmp.ne.s32.totalorder %s1441_s10, %s1442_s22  ;;  %s1446_s12 = scalar_lea.hbm %s1953_s5, 16 }
  0x21   : > { %603 = vmatpush.msra.mxu2 %v377_v24  ;;  %671 = vmatpush.msra.mxu3 %v378_v25  ;;  %v369_v32 = vld [vmem:[%s1949_s1 + $0x30] sm:$0xff]  ;;  %v370_v33 = vld [vmem:[%s1949_s1 + $0x38] sm:$0xff]  ;;  %v251_v35 = vld [vmem:[%s1592_s16 + $0x48] sm:$0xff]  ;;  %p1447_p3 = scmp.lt.s32.totalorder %s1441_s10, %s1953_s5  ;;  %p1448_p4 = scmp.lt.s32.totalorder %s1446_s12, %s1442_s22 }
  0x22   : > { %469 = vmatpush.msra.mxu0 %v371_v26  ;;  %536 = vmatpush.msra.mxu1 %v372_v27  ;;  %v252_v34 = vld [vmem:[%s1592_s16 + $0x50] sm:$0xff]  ;;  %v253_v36 = vld [vmem:[%s1592_s16 + $0x58] sm:$0xff]  ;;  %v255_v37 = vld [vmem:[%s1592_s16 + $0x68] sm:$0xff]  ;;  %p1444_p1 = pnand %p1443_p0, %p1568_p5 }
  0x23   : > { %604 = vmatpush.msra.mxu2 %v373_v28  ;;  %672 = vmatpush.msra.mxu3 %v374_v29  ;;  %v254_v38 = vld [vmem:[%s1592_s16 + $0x60] sm:$0xff]  ;;  %v256_v39 = vld [vmem:[%s1592_s16 + $0x70] sm:$0xff]  ;;  %v257_v41 = vld [vmem:[%s1592_s16 + $0x78] sm:$0xff]  ;;  %p1449_p7 = por %p1448_p4, %p1447_p3 }
  0x24   : > { %470 = vmatpush.msra.mxu0 %v367_v30  ;;  %537 = vmatpush.msra.mxu1 %v368_v31  ;;  %v258_v40 = vld [vmem:[%s1592_s16 + $0x80] sm:$0xff]  ;;  %v364_v43 = vld [vmem:[%s1949_s1 + $0x8] sm:$0xff]  ;;  %v365_v44 = vld [vmem:[%s1949_s1 + $0x10] sm:$0xff]  ;;  %p1445_p2 = pneg %p1444_p1 }
  0x25   : > { %605 = vmatpush.msra.mxu2 %v369_v32  ;;  %673 = vmatpush.msra.mxu3 %v370_v33  ;;  %v363_v42 = vld [vmem:[%s1949_s1] sm:$0xff]  ;;  %v366_v45 = vld [vmem:[%s1949_s1 + $0x18] sm:$0xff] }
  0x26   : > { %271 = vperm.xlu1 %1392, %v245_v4   ;;  %265 = vperm.xlu0 %1391, %v243_v5   ;;  %p1450_p8 = pnand %p1449_p7, %p1445_p2 }
  0x27   : > { %277 = vperm.xlu2 %1393, %v247_v6   ;;  %471 = vmatpush.msra.mxu0 %v363_v42 }
  0x28   : > { %538 = vmatpush.msra.mxu1 %v364_v43  ;;  %606 = vmatpush.msra.mxu2 %v365_v44 }
  0x29   : > { %674 = vmatpush.msra.mxu3 %v366_v45  ;;  %v977_v45 = vshrl.u32 %v259_v46, 7 }
  0x2e   : > { %283 = vperm.xlu1 %1392, %v249_v19   ;;  %280 = vperm.xlu0 %1391, %v248_v20  }
  0x2f   : > { %286 = vperm.xlu2 %1393, %v250_v23  }
  0x36   : > { %292 = vperm.xlu1 %1392, %v252_v34   ;;  %289 = vperm.xlu0 %1391, %v251_v35  }
  0x37   : > { %295 = vperm.xlu2 %1393, %v253_v36  }
  0x3e   : > { %301 = vperm.xlu1 %1392, %v255_v37   ;;  %298 = vperm.xlu0 %1391, %v254_v38   ;;  %v1092_v37 = vld [vmem:[#allocation2 + $0x78] sm:$0xff]  ;;  %v1091_v38 = vld [vmem:[#allocation2 + $0x70] sm:$0xff] }
  0x3f   : > { %304 = vperm.xlu2 %1393, %v256_v39   ;;  %1127 = vmatpush.msrb.mxu0 %v1092_v37 }
  0x41   : > { %1128 = vmatpush.msrb.mxu0 %v1091_v38 }
  0x46   : > { %310 = vperm.xlu1 %1392, %v258_v40   ;;  %307 = vperm.xlu0 %1391, %v257_v41  }
  0x79   : > { %v275_v57 = vpop.permute.xlu2 %274 }
  0x7a   : > { %vm316_vm6 = vcmp.eq.s32.totalorder %v275_v57, %v1696_v47 }
  0x7b   : > { %v1247_v58 = vsel %vm316_vm6, 1.0, %v1498_v49  ;;  %vm910_vm6 = vcmask 1044480  }
  0x81   : > { %v278_v59 = vpop.permute.xlu2 %277 }
  0x82   : > { %vm317_vm7 = vcmp.eq.s32.totalorder %v278_v59, %v1696_v47 }
  0x83   : > { %v1248_v60 = vsel %vm317_vm7, 1.0, %v1498_v49  ;;  %vm981_vm7 = vcmp.lt.s32.totalorder %v1696_v47, 16 }
  0x89   : > { %v287_v1 = vpop.permute.xlu2 %286 }
  0x8a   : > { %vm320_vm10 = vcmp.eq.s32.totalorder %v287_v1, %v1696_v47 }
  0x8b   : > { %v1251_v2 = vsel %vm320_vm10, 1.0, %v1498_v49  ;;  %vm1109_vm10 = vcmask 1042434  }
  0x90   : > { %v263_v48 = vpop.permute.xlu0 %262  ;;  %v269_v53 = vpop.permute.xlu1 %268 }
  0x91   : > { %vm312_vm2 = vcmp.eq.s32.totalorder %v263_v48, %v1696_v47  ;;  %vm314_vm4 = vcmp.eq.s32.totalorder %v269_v53, %v1696_v47  ;;  %v296_v7 = vpop.permute.xlu2 %295 }
  0x92   : > { %v1243_v50 = vsel %vm312_vm2, 1.0, %v1498_v49  ;;  %v1245_v54 = vsel %vm314_vm4, 1.0, %v1498_v49  ;;  %vm323_vm13 = vcmp.eq.s32.totalorder %v296_v7, %v1696_v47  ;;  %vm744_vm4 = vcmask 1046528  }
  0x93   : > { %1261 = vmatmul.msk.f32.vlgmr.msra.gmra.mxu0 %vm391_vm1, %v1243_v50  ;;  %1279 = vmatmul.msk.f32.vlgmr.msra.gmra.mxu1 %vm391_vm1, %v1243_v50  ;;  %v1254_v8 = vsel %vm323_vm13, 1.0, %v1498_v49  ;;  %vm1118_vm13 = vcmask 1045509  }
  0x94   : > { %1297 = vmatmul.msk.f32.vlgmr.msra.gmra.mxu2 %vm391_vm1, %v1243_v50  ;;  %1315 = vmatmul.msk.f32.vlgmr.msra.gmra.mxu3 %vm391_vm1, %v1243_v50 }
  0x98   : > { %v266_v51 = vpop.permute.xlu0 %265  ;;  %v272_v55 = vpop.permute.xlu1 %271 }
  0x99   : > { %vm313_vm3 = vcmp.eq.s32.totalorder %v266_v51, %v1696_v47  ;;  %vm315_vm5 = vcmp.eq.s32.totalorder %v272_v55, %v1696_v47  ;;  %v305_v13 = vpop.permute.xlu2 %304  ;;  %v978_v55 = vadd.s32 8, %v977_v45 }
  0x9a   : > { %v1244_v52 = vsel %vm313_vm3, 1.0, %v1498_v49  ;;  %v1246_v56 = vsel %vm315_vm5, 1.0, %v1498_v49  ;;  %vm326_vm0 = vcmp.eq.s32.totalorder %v305_v13, %v1696_v47  ;;  %vm827_vm5 = vcmask 1045504  }
  0x9b   : > { %1262 = vmatmul.msk.f32.gmra.mxu0 %vm391_vm1, %v1244_v52  ;;  %1280 = vmatmul.msk.f32.gmra.mxu1 %vm391_vm1, %v1244_v52  ;;  %v1257_v14 = vsel %vm326_vm0, 1.0, %v1498_v49 }
  0x9c   : > { %1298 = vmatmul.msk.f32.gmra.mxu2 %vm391_vm1, %v1244_v52  ;;  %1316 = vmatmul.msk.f32.gmra.mxu3 %vm391_vm1, %v1244_v52 }
  0xa0   : > { %v281_v61 = vpop.permute.xlu0 %280  ;;  %v284_v63 = vpop.permute.xlu1 %283 }
  0xa1   : > { %vm318_vm8 = vcmp.eq.s32.totalorder %v281_v61, %v1696_v47  ;;  %vm319_vm9 = vcmp.eq.s32.totalorder %v284_v63, %v1696_v47 }
  0xa2   : > { %v1249_v62 = vsel %vm318_vm8, 1.0, %v1498_v49  ;;  %v1250_v0 = vsel %vm319_vm9, 1.0, %v1498_v49  ;;  %vm1106_vm9 = vcmask 1041409  }
  0xa3   : > { %1263 = vmatmul.msk.f32.gmra.mxu0 %vm391_vm1, %v1245_v54  ;;  %1281 = vmatmul.msk.f32.gmra.mxu1 %vm391_vm1, %v1245_v54 }
  0xa4   : > { %1299 = vmatmul.msk.f32.gmra.mxu2 %vm391_vm1, %v1245_v54  ;;  %1317 = vmatmul.msk.f32.gmra.mxu3 %vm391_vm1, %v1245_v54 }
  0xa8   : > { %v290_v3 = vpop.permute.xlu0 %289  ;;  %v293_v5 = vpop.permute.xlu1 %292 }
  0xa9   : > { %vm321_vm11 = vcmp.eq.s32.totalorder %v290_v3, %v1696_v47  ;;  %vm322_vm12 = vcmp.eq.s32.totalorder %v293_v5, %v1696_v47 }
  0xaa   : > { %v1252_v4 = vsel %vm321_vm11, 1.0, %v1498_v49  ;;  %v1253_v6 = vsel %vm322_vm12, 1.0, %v1498_v49  ;;  %vm1112_vm11 = vcmask 1043459   ;;  %vm1115_vm12 = vcmask 1044484  }
  0xab   : > { %1264 = vmatmul.msk.f32.gmra.mxu0 %vm391_vm1, %v1246_v56  ;;  %1282 = vmatmul.msk.f32.gmra.mxu1 %vm391_vm1, %v1246_v56 }
  0xac   : > { %1300 = vmatmul.msk.f32.gmra.mxu2 %vm391_vm1, %v1246_v56  ;;  %1318 = vmatmul.msk.f32.gmra.mxu3 %vm391_vm1, %v1246_v56 }
  0xb0   : > { %v299_v9 = vpop.permute.xlu0 %298  ;;  %v302_v11 = vpop.permute.xlu1 %301 }
  0xb1   : > { %vm324_vm14 = vcmp.eq.s32.totalorder %v299_v9, %v1696_v47  ;;  %vm325_vm15 = vcmp.eq.s32.totalorder %v302_v11, %v1696_v47 }
  0xb2   : > { %v1255_v10 = vsel %vm324_vm14, 1.0, %v1498_v49  ;;  %v1256_v12 = vsel %vm325_vm15, 1.0, %v1498_v49  ;;  %vm1121_vm14 = vcmask 1046534   ;;  %vm1124_vm15 = vcmask 1047559  }
  0xb3   : > { %1265 = vmatmul.msk.f32.gmra.mxu0 %vm391_vm1, %v1247_v58  ;;  %1283 = vmatmul.msk.f32.gmra.mxu1 %vm391_vm1, %v1247_v58 }
  0xb4   : > { %1301 = vmatmul.msk.f32.gmra.mxu2 %vm391_vm1, %v1247_v58  ;;  %1319 = vmatmul.msk.f32.gmra.mxu3 %vm391_vm1, %v1247_v58 }
  0xb8   : > { %v308_v15 = vpop.permute.xlu0 %307  ;;  %v311_v17 = vpop.permute.xlu1 %310 }
  0xb9   : > { %vm327_vm2 = vcmp.eq.s32.totalorder %v308_v15, %v1696_v47  ;;  %vm328_vm3 = vcmp.eq.s32.totalorder %v311_v17, %v1696_v47 }
  0xba   : > { %v1258_v16 = vsel %vm327_vm2, 1.0, %v1498_v49  ;;  %v1259_v20 = vsel %vm328_vm3, 1.0, %v1498_v49  ;;  %v1499_v49 = vmov 13  }
  0xbb   : > { %1266 = vmatmul.msk.f32.gmra.mxu0 %vm391_vm1, %v1248_v60  ;;  %1284 = vmatmul.msk.f32.gmra.mxu1 %vm391_vm1, %v1248_v60 }
  0xbc   : > { %1302 = vmatmul.msk.f32.gmra.mxu2 %vm391_vm1, %v1248_v60  ;;  %1320 = vmatmul.msk.f32.gmra.mxu3 %vm391_vm1, %v1248_v60 }
  0xc3   : > { %1267 = vmatmul.msk.f32.gmra.mxu0 %vm391_vm1, %v1249_v62  ;;  %1285 = vmatmul.msk.f32.gmra.mxu1 %vm391_vm1, %v1249_v62 }
  0xc4   : > { %1303 = vmatmul.msk.f32.gmra.mxu2 %vm391_vm1, %v1249_v62  ;;  %1321 = vmatmul.msk.f32.gmra.mxu3 %vm391_vm1, %v1249_v62 }
  0xcb   : > { %1268 = vmatmul.msk.f32.gmra.mxu0 %vm391_vm1, %v1250_v0  ;;  %1286 = vmatmul.msk.f32.gmra.mxu1 %vm391_vm1, %v1250_v0 }
  0xcc   : > { %1304 = vmatmul.msk.f32.gmra.mxu2 %vm391_vm1, %v1250_v0  ;;  %1322 = vmatmul.msk.f32.gmra.mxu3 %vm391_vm1, %v1250_v0 }
  0xd3   : > { %1269 = vmatmul.msk.f32.gmra.mxu0 %vm391_vm1, %v1251_v2  ;;  %1287 = vmatmul.msk.f32.gmra.mxu1 %vm391_vm1, %v1251_v2 }
  0xd4   : > { %1305 = vmatmul.msk.f32.gmra.mxu2 %vm391_vm1, %v1251_v2  ;;  %1323 = vmatmul.msk.f32.gmra.mxu3 %vm391_vm1, %v1251_v2 }
  0xdb   : > { %1270 = vmatmul.msk.f32.gmra.mxu0 %vm391_vm1, %v1252_v4  ;;  %1288 = vmatmul.msk.f32.gmra.mxu1 %vm391_vm1, %v1252_v4 }
  0xdc   : > { %1306 = vmatmul.msk.f32.gmra.mxu2 %vm391_vm1, %v1252_v4  ;;  %1324 = vmatmul.msk.f32.gmra.mxu3 %vm391_vm1, %v1252_v4 }
  0xe3   : > { %1271 = vmatmul.msk.f32.gmra.mxu0 %vm391_vm1, %v1253_v6  ;;  %1289 = vmatmul.msk.f32.gmra.mxu1 %vm391_vm1, %v1253_v6 }
  0xe4   : > { %1307 = vmatmul.msk.f32.gmra.mxu2 %vm391_vm1, %v1253_v6  ;;  %1325 = vmatmul.msk.f32.gmra.mxu3 %vm391_vm1, %v1253_v6 }
  0xeb   : > { %1272 = vmatmul.msk.f32.gmra.mxu0 %vm391_vm1, %v1254_v8  ;;  %1290 = vmatmul.msk.f32.gmra.mxu1 %vm391_vm1, %v1254_v8 }
  0xec   : > { %1308 = vmatmul.msk.f32.gmra.mxu2 %vm391_vm1, %v1254_v8  ;;  %1326 = vmatmul.msk.f32.gmra.mxu3 %vm391_vm1, %v1254_v8 }
  0xf3   : > { %1273 = vmatmul.msk.f32.gmra.mxu0 %vm391_vm1, %v1255_v10  ;;  %1291 = vmatmul.msk.f32.gmra.mxu1 %vm391_vm1, %v1255_v10 }
  0xf4   : > { %1309 = vmatmul.msk.f32.gmra.mxu2 %vm391_vm1, %v1255_v10  ;;  %1327 = vmatmul.msk.f32.gmra.mxu3 %vm391_vm1, %v1255_v10 }
  0xfb   : > { %1274 = vmatmul.msk.f32.gmra.mxu0 %vm391_vm1, %v1256_v12  ;;  %1292 = vmatmul.msk.f32.gmra.mxu1 %vm391_vm1, %v1256_v12 }
  0xfc   : > { %1310 = vmatmul.msk.f32.gmra.mxu2 %vm391_vm1, %v1256_v12  ;;  %1328 = vmatmul.msk.f32.gmra.mxu3 %vm391_vm1, %v1256_v12  ;;  %v1090_v12 = vld [vmem:[#allocation2 + $0x68] sm:$0xff] }
  0xfd   : > { %1129 = vmatpush.msrb.mxu0 %v1090_v12 }
 0x103   : > { %1275 = vmatmul.msk.f32.gmra.mxu0 %vm391_vm1, %v1257_v14  ;;  %1293 = vmatmul.msk.f32.gmra.mxu1 %vm391_vm1, %v1257_v14 }
 0x104   : > { %1311 = vmatmul.msk.f32.gmra.mxu2 %vm391_vm1, %v1257_v14  ;;  %1329 = vmatmul.msk.f32.gmra.mxu3 %vm391_vm1, %v1257_v14 }
 0x10b   : > { %1276 = vmatmul.msk.f32.gmra.mxu0 %vm391_vm1, %v1258_v16  ;;  %1294 = vmatmul.msk.f32.gmra.mxu1 %vm391_vm1, %v1258_v16 }
 0x10c   : > { %1312 = vmatmul.msk.f32.gmra.mxu2 %vm391_vm1, %v1258_v16  ;;  %1330 = vmatmul.msk.f32.gmra.mxu3 %vm391_vm1, %v1258_v16 }
 0x110   : > { %v473_v18 = vpop.f32.mrf.mxu0  ;;  %v540_v19 = vpop.f32.mrf.mxu1 }
 0x111   : > { %v745_v25 = vrot.slane %v540_v19, 1 }
 0x113   : > { %1277 = vmatmul.msk.f32.gmra.mxu0 %vm391_vm1, %v1259_v20  ;;  %1295 = vmatmul.msk.f32.gmra.mxu1 %vm391_vm1, %v1259_v20 }
 0x114   : > { %1313 = vmatmul.msk.f32.gmra.mxu2 %vm391_vm1, %v1259_v20  ;;  %1331 = vmatmul.msk.f32.gmra.mxu3 %vm391_vm1, %v1259_v20  ;;  %vm979_vm1 = vcmp.lt.s32.totalorder %v1696_v47, 32 }
 0x115   : > { %v980_v50 = vsel %vm979_vm1, 14, %v1499_v49 }
 0x116   : > { %v982_v58 = vsel %vm981_vm7, 15, %v980_v50 }
 0x117   : > { %v608_v21 = vpop.f32.mrf.mxu2  ;;  %v676_v22 = vpop.f32.mrf.mxu3  ;;  %vm1810_vm8 = vcmp.lt.s32.totalorder %v978_v55, %v982_v58 }
 0x118   : > { %v476_v23 = vpop.f32.mrf.mxu0  ;;  %v543_v24 = vpop.f32.mrf.mxu1  ;;  %v828_v31 = vrot.slane %v608_v21, 2  ;;  %v911_v32 = vrot.slane %v676_v22, 3 }
 0x119   : > { %v746_v26 = vrot.slane %v543_v24, 1 }
 0x11b   : > { %v747_v27 = vsel %vm744_vm4, %v745_v25, %v746_v26 }
 0x11c   : > { %v794_v28 = vadd.f32 %v747_v27, %v473_v18 }
 0x11f   : > { %v611_v29 = vpop.f32.mrf.mxu2  ;;  %v679_v30 = vpop.f32.mrf.mxu3 }
 0x120   : > { %v829_v33 = vrot.slane %v611_v29, 2  ;;  %v912_v34 = vrot.slane %v679_v30, 3  ;;  %v479_v35 = vpop.f32.mrf.mxu0  ;;  %v546_v36 = vpop.f32.mrf.mxu1 }
 0x121   : > { %v748_v39 = vrot.slane %v546_v36, 1 }
 0x122   : > { %v830_v40 = vsel %vm827_vm5, %v828_v31, %v829_v33  ;;  %v913_v41 = vsel %vm910_vm6, %v911_v32, %v912_v34 }
 0x123   : > { %v877_v42 = vadd.f32 %v830_v40, %v794_v28  ;;  %v749_v43 = vsel %vm744_vm4, %v746_v26, %v748_v39 }
 0x124   : > { %v795_v44 = vadd.f32 %v749_v43, %v476_v23 }
 0x125   : > { %v960_v48 = vadd.f32 %v913_v41, %v877_v42  ;;  %v1089_v41 = vld [vmem:[#allocation2 + $0x60] sm:$0xff]  ;;  %v1088_v42 = vld [vmem:[#allocation2 + $0x58] sm:$0xff] }
 0x126   : > { %1130 = vmatpush.msrb.mxu0 %v1089_v41 }
 0x127   : > { %v614_v51 = vpop.f32.mrf.mxu2  ;;  %v682_v52 = vpop.f32.mrf.mxu3 }
 0x128   : > { %v831_v53 = vrot.slane %v614_v51, 2  ;;  %v914_v54 = vrot.slane %v682_v52, 3  ;;  %v482_v56 = vpop.f32.mrf.mxu0  ;;  %v549_v57 = vpop.f32.mrf.mxu1  ;;  %1131 = vmatpush.msrb.mxu0 %v1088_v42 }
 0x129   : > { %v750_v59 = vrot.slane %v549_v57, 1 }
 0x12a   : > { %v832_v60 = vsel %vm827_vm5, %v829_v33, %v831_v53  ;;  %v915_v61 = vsel %vm910_vm6, %v912_v34, %v914_v54 }
 0x12b   : > { %v878_v62 = vadd.f32 %v832_v60, %v795_v44  ;;  %v751_v46 = vsel %vm744_vm4, %v748_v39, %v750_v59 }
 0x12c   : > { %v796_v47 = vadd.f32 %v751_v46, %v479_v35 }
 0x12d   : > { %v961_v0 = vadd.f32 %v915_v61, %v878_v62 }
 0x12f   : > { %v986_v1 = vsel %vm1810_vm8, %v961_v0, -1e+30  ;;  %v617_v2 = vpop.f32.mrf.mxu2  ;;  %v685_v3 = vpop.f32.mrf.mxu3  ;;  %v1830_v0 = vld [vmem:[%s1950_s2] ss:$0 sm:$0xff] }
 0x130   : > { %v1001_v4 = vmax.f32 %v960_v48, %v986_v1  ;;  %v833_v5 = vrot.slane %v617_v2, 2  ;;  %v916_v6 = vrot.slane %v685_v3, 3  ;;  %v485_v7 = vpop.f32.mrf.mxu0  ;;  %v552_v8 = vpop.f32.mrf.mxu1 }
 0x131   : > { %v752_v9 = vrot.slane %v552_v8, 1 }
 0x132   : > { %v834_v10 = vsel %vm827_vm5, %v831_v53, %v833_v5  ;;  %v917_v11 = vsel %vm910_vm6, %v914_v54, %v916_v6  ;;  %v1002_v16 = vrot.slane %v1001_v4, 4 }
 0x133   : > { %v879_v13 = vadd.f32 %v834_v10, %v796_v47  ;;  %v753_v14 = vsel %vm744_vm4, %v750_v59, %v752_v9  ;;  %v1086_v10 = vld [vmem:[#allocation2 + $0x48] sm:$0xff] }
 0x134   : > { %v797_v15 = vadd.f32 %v753_v14, %v482_v56  ;;  %v1003_v24 = vmax.f32 %v1001_v4, %v1002_v16 }
 0x135   : > { %v962_v17 = vadd.f32 %v917_v11, %v879_v13 }
 0x136   : > { %v1004_v31 = vrot.slane %v1003_v24, 2 }
 0x137   : > { %v620_v18 = vpop.f32.mrf.mxu2  ;;  %v688_v19 = vpop.f32.mrf.mxu3 }
 0x138   : > { %v835_v20 = vrot.slane %v620_v18, 2  ;;  %v918_v21 = vrot.slane %v688_v19, 3  ;;  %v488_v22 = vpop.f32.mrf.mxu0  ;;  %v555_v23 = vpop.f32.mrf.mxu1  ;;  %v1005_v43 = vmax.f32 %v1003_v24, %v1004_v31 }
 0x139   : > { %v754_v25 = vrot.slane %v555_v23, 1 }
 0x13a   : > { %v836_v26 = vsel %vm827_vm5, %v833_v5, %v835_v20  ;;  %v919_v27 = vsel %vm910_vm6, %v916_v6, %v918_v21  ;;  %v1006_v54 = vrot.slane %v1005_v43, 1 }
 0x13b   : > { %v880_v28 = vadd.f32 %v836_v26, %v797_v15  ;;  %v755_v29 = vsel %vm744_vm4, %v752_v9, %v754_v25  ;;  %v1087_v9 = vld [vmem:[#allocation2 + $0x50] sm:$0xff] }
 0x13c   : > { %v798_v30 = vadd.f32 %v755_v29, %v485_v7  ;;  %v1007_v47 = vmax.f32 %v1005_v43, %v1006_v54  ;;  %1132 = vmatpush.msrb.mxu0 %v1087_v9 }
 0x13d   : > { %v963_v32 = vadd.f32 %v919_v27, %v880_v28 }
 0x13e   : > { %v1061_v11 = vadd.f32 %v1830_v0, %v1007_v47  ;;  %1133 = vmatpush.msrb.mxu0 %v1086_v10 }
 0x13f   : > { %v988_v33 = vsel %vm1810_vm8, %v963_v32, -1e+30  ;;  %v623_v34 = vpop.f32.mrf.mxu2  ;;  %v691_v35 = vpop.f32.mrf.mxu3 }
 0x140   : > { %v1008_v36 = vmax.f32 %v962_v17, %v988_v33  ;;  %v837_v37 = vrot.slane %v623_v34, 2  ;;  %v920_v38 = vrot.slane %v691_v35, 3  ;;  %v491_v39 = vpop.f32.mrf.mxu0  ;;  %v558_v40 = vpop.f32.mrf.mxu1  ;;  %v1069_v23 = vmax.f32 %v1061_v11, 0.0 }
 0x141   : > { %v756_v44 = vrot.slane %v558_v40, 1 }
 0x142   : > { %v1009_v45 = vrot.slane %v1008_v36, 4  ;;  %v838_v48 = vsel %vm827_vm5, %v835_v20, %v837_v37  ;;  %v921_v49 = vsel %vm910_vm6, %v918_v21, %v920_v38 }
 0x143   : > { %v881_v50 = vadd.f32 %v838_v48, %v798_v30  ;;  %v757_v51 = vsel %vm744_vm4, %v754_v25, %v756_v44 }
 0x144   : > { %v1010_v52 = vmax.f32 %v1008_v36, %v1009_v45  ;;  %v799_v53 = vadd.f32 %v757_v51, %v488_v22  ;;  %v1084_v51 = vld [vmem:[#allocation2 + $0x38] sm:$0xff] }
 0x145   : > { %v964_v55 = vadd.f32 %v921_v49, %v881_v50  ;;  %v1085_v50 = vld [vmem:[#allocation2 + $0x40] sm:$0xff] }
 0x146   : > { %v1011_v56 = vrot.slane %v1010_v52, 2  ;;  %1134 = vmatpush.msrb.mxu0 %v1085_v50 }
 0x147   : > { %v626_v57 = vpop.f32.mrf.mxu2  ;;  %v694_v58 = vpop.f32.mrf.mxu3 }
 0x148   : > { %v1012_v59 = vmax.f32 %v1010_v52, %v1011_v56  ;;  %v839_v60 = vrot.slane %v626_v57, 2  ;;  %v922_v61 = vrot.slane %v694_v58, 3  ;;  %v494_v62 = vpop.f32.mrf.mxu0  ;;  %v561_v46 = vpop.f32.mrf.mxu1  ;;  %1135 = vmatpush.msrb.mxu0 %v1084_v51 }
 0x149   : > { %v758_v1 = vrot.slane %v561_v46, 1 }
 0x14a   : > { %v1013_v2 = vrot.slane %v1012_v59, 1  ;;  %v840_v3 = vsel %vm827_vm5, %v837_v37, %v839_v60  ;;  %v923_v4 = vsel %vm910_vm6, %v920_v38, %v922_v61 }
 0x14b   : > { %v882_v5 = vadd.f32 %v840_v3, %v799_v53  ;;  %v759_v6 = vsel %vm744_vm4, %v756_v44, %v758_v1 }
 0x14c   : > { %v1014_v7 = vmax.f32 %v1012_v59, %v1013_v2  ;;  %v800_v8 = vadd.f32 %v759_v6, %v491_v39 }
 0x14d   : > { %v965_v12 = vadd.f32 %v923_v4, %v882_v5 }
 0x14e   : > { %v1062_v13 = vadd.f32 %v1830_v0, %v1014_v7 }
 0x14f   : > { %v990_v14 = vsel %vm1810_vm8, %v965_v12, -1e+30  ;;  %v629_v15 = vpop.f32.mrf.mxu2  ;;  %v697_v16 = vpop.f32.mrf.mxu3 }
 0x150   : > { %v1070_v17 = vmax.f32 %v1062_v13, 0.0  ;;  %v1015_v18 = vmax.f32 %v964_v55, %v990_v14  ;;  %v841_v19 = vrot.slane %v629_v15, 2  ;;  %v924_v20 = vrot.slane %v697_v16, 3  ;;  %v497_v21 = vpop.f32.mrf.mxu0  ;;  %v564_v22 = vpop.f32.mrf.mxu1 }
 0x151   : > { %v760_v24 = vrot.slane %v564_v22, 1  ;;  %v1083_v22 = vld [vmem:[#allocation2 + $0x30] sm:$0xff] }
 0x152   : > { %v1105_v25 = vrot.slane %v1070_v17, 7  ;;  %v1016_v26 = vrot.slane %v1015_v18, 4  ;;  %v842_v27 = vsel %vm827_vm5, %v839_v60, %v841_v19  ;;  %v925_v28 = vsel %vm910_vm6, %v922_v61, %v924_v20  ;;  %1136 = vmatpush.msrb.mxu0 %v1083_v22 }
 0x153   : > { %v883_v29 = vadd.f32 %v842_v27, %v800_v8  ;;  %v761_v30 = vsel %vm744_vm4, %v758_v1, %v760_v24 }
 0x154   : > { %v1017_v31 = vmax.f32 %v1015_v18, %v1016_v26  ;;  %v801_v32 = vadd.f32 %v761_v30, %v494_v62  ;;  %v1107_v33 = vsel %vm1106_vm9, %v1105_v25, %v1069_v23  ;;  %v1082_v23 = vld [vmem:[#allocation2 + $0x28] sm:$0xff] }
 0x155   : > { %v966_v34 = vadd.f32 %v925_v28, %v883_v29  ;;  %1137 = vmatpush.msrb.mxu0 %v1082_v23  ;;  %v1079_v23 = vld [vmem:[#allocation2 + $0x10] sm:$0xff] }
 0x156   : > { %v1018_v35 = vrot.slane %v1017_v31, 2 }
 0x157   : > { %v632_v36 = vpop.f32.mrf.mxu2  ;;  %v700_v37 = vpop.f32.mrf.mxu3 }
 0x158   : > { %v1019_v38 = vmax.f32 %v1017_v31, %v1018_v35  ;;  %v843_v39 = vrot.slane %v632_v36, 2  ;;  %v926_v40 = vrot.slane %v700_v37, 3  ;;  %v500_v41 = vpop.f32.mrf.mxu0  ;;  %v567_v42 = vpop.f32.mrf.mxu1 }
 0x159   : > { %v762_v61 = vrot.slane %v567_v42, 1 }
 0x15a   : > { %v1020_v43 = vrot.slane %v1019_v38, 1  ;;  %v844_v44 = vsel %vm827_vm5, %v841_v19, %v843_v39  ;;  %v927_v49 = vsel %vm910_vm6, %v924_v20, %v926_v40 }
 0x15b   : > { %v884_v45 = vadd.f32 %v844_v44, %v801_v32  ;;  %v763_v4 = vsel %vm744_vm4, %v760_v24, %v762_v61 }
 0x15c   : > { %v1021_v48 = vmax.f32 %v1019_v38, %v1020_v43  ;;  %v802_v11 = vadd.f32 %v763_v4, %v497_v21 }
 0x15d   : > { %v967_v52 = vadd.f32 %v927_v49, %v884_v45 }
 0x15e   : > { %v1063_v53 = vadd.f32 %v1830_v0, %v1021_v48 }
 0x15f   : > { %v992_v54 = vsel %vm1810_vm8, %v967_v52, -1e+30  ;;  %v635_v55 = vpop.f32.mrf.mxu2  ;;  %v703_v56 = vpop.f32.mrf.mxu3  ;;  %v1081_v52 = vld [vmem:[#allocation2 + $0x20] sm:$0xff] }
 0x160   : > { %v1071_v57 = vmax.f32 %v1063_v53, 0.0  ;;  %v1022_v58 = vmax.f32 %v966_v34, %v992_v54  ;;  %v1847_v59 = vpop.f32.mrf.mxu0  ;;  %v1849_v60 = vpop.f32.mrf.mxu1  ;;  %v845_v1 = vrot.slane %v635_v55, 2  ;;  %v928_v16 = vrot.slane %v703_v56, 3  ;;  %v1080_v53 = vld [vmem:[#allocation2 + $0x18] sm:$0xff]  ;;  %1138 = vmatpush.msrb.mxu0 %v1081_v52 }
 0x161   : > { %v764_v46 = vrot.slane %v1849_v60, 1 }
 0x162   : > { %v1023_v62 = vrot.slane %v1022_v58, 4  ;;  %v1108_v47 = vrot.slane %v1071_v57, 6  ;;  %v846_v7 = vsel %vm827_vm5, %v843_v39, %v845_v1  ;;  %v929_v26 = vsel %vm910_vm6, %v926_v40, %v928_v16  ;;  %1139 = vmatpush.msrb.mxu0 %v1080_v53 }
 0x163   : > { %v765_v6 = vsel %vm744_vm4, %v762_v61, %v764_v46  ;;  %v885_v19 = vadd.f32 %v846_v7, %v802_v11 }
 0x164   : > { %v1024_v2 = vmax.f32 %v1022_v58, %v1023_v62  ;;  %v1110_v3 = vsel %vm1109_vm10, %v1108_v47, %v1107_v33  ;;  %v803_v17 = vadd.f32 %v765_v6, %v500_v41  ;;  %1140 = vmatpush.msrb.mxu0 %v1079_v23 }
 0x165   : > { %v968_v28 = vadd.f32 %v929_v26, %v885_v19 }
 0x166   : > { %v1025_v5 = vrot.slane %v1024_v2, 2 }
 0x167   : > { %v1857_v8 = vpop.f32.mrf.mxu2  ;;  %v1859_v9 = vpop.f32.mrf.mxu3 }
 0x168   : > { %v1026_v10 = vmax.f32 %v1024_v2, %v1025_v5  ;;  %v847_v12 = vrot.slane %v1857_v8, 2  ;;  %v930_v13 = vrot.slane %v1859_v9, 3  ;;  %v506_v14 = vpop.f32.mrf.mxu0  ;;  %v573_v15 = vpop.f32.mrf.mxu1 }
 0x169   : > { %v766_v48 = vrot.slane %v573_v15, 1 }
 0x16a   : > { %v1027_v18 = vrot.slane %v1026_v10, 1  ;;  %v848_v20 = vsel %vm827_vm5, %v845_v1, %v847_v12  ;;  %v931_v21 = vsel %vm910_vm6, %v928_v16, %v930_v13 }
 0x16b   : > { %v886_v24 = vadd.f32 %v848_v20, %v803_v17  ;;  %v767_v1 = vsel %vm744_vm4, %v764_v46, %v766_v48 }
 0x16c   : > { %v1028_v25 = vmax.f32 %v1026_v10, %v1027_v18 }
 0x16d   : > { %v969_v27 = vadd.f32 %v931_v21, %v886_v24  ;;  %v1078_v24 = vld [vmem:[#allocation2 + $0x8] sm:$0xff] }
 0x16e   : > { %v1064_v29 = vadd.f32 %v1830_v0, %v1028_v25  ;;  %1141 = vmatpush.msrb.mxu0 %v1078_v24 }
 0x16f   : > { %v994_v30 = vsel %vm1810_vm8, %v969_v27, -1e+30  ;;  %v641_v31 = vpop.f32.mrf.mxu2  ;;  %v709_v32 = vpop.f32.mrf.mxu3 }
 0x170   : > { %v1029_v33 = vmax.f32 %v968_v28, %v994_v30  ;;  %v509_v34 = vpop.f32.mrf.mxu0  ;;  %v576_v35 = vpop.f32.mrf.mxu1  ;;  %v1072_v36 = vmax.f32 %v1064_v29, 0.0  ;;  %v849_v55 = vrot.slane %v641_v31, 2  ;;  %v932_v5 = vrot.slane %v709_v32, 3 }
 0x171   : > { %v768_v42 = vrot.slane %v576_v35, 1 }
 0x172   : > { %v1030_v37 = vrot.slane %v1029_v33, 4  ;;  %v1111_v38 = vrot.slane %v1072_v36, 5  ;;  %v850_v10 = vsel %vm827_vm5, %v847_v12, %v849_v55  ;;  %v933_v12 = vsel %vm910_vm6, %v930_v13, %v932_v5 }
 0x173   : > { %v769_v56 = vsel %vm744_vm4, %v766_v48, %v768_v42 }
 0x174   : > { %v1031_v39 = vmax.f32 %v1029_v33, %v1030_v37  ;;  %v1113_v41 = vsel %vm1112_vm11, %v1111_v38, %v1110_v3  ;;  %v805_v61 = vadd.f32 %v769_v56, %v506_v14  ;;  %v804_v14 = vadd.f32 %v767_v1, %v1847_v59  ;;  %v1077_v33 = vld [vmem:[#allocation2] sm:$0xff] }
 0x175   : > { %1142 = vmatpush.msrb.mxu0 %v1077_v33 }
 0x176   : > { %v1032_v40 = vrot.slane %v1031_v39, 2  ;;  %v887_v18 = vadd.f32 %v850_v10, %v804_v14 }
 0x177   : > { %v644_v43 = vpop.f32.mrf.mxu2  ;;  %v1871_v44 = vpop.f32.mrf.mxu3 }
 0x178   : > { %v1033_v45 = vmax.f32 %v1031_v39, %v1032_v40  ;;  %v851_v49 = vrot.slane %v644_v43, 2  ;;  %v512_v50 = vpop.f32.mrf.mxu0  ;;  %v579_v51 = vpop.f32.mrf.mxu1  ;;  %v934_v62 = vrot.slane %v1871_v44, 3  ;;  %v970_v27 = vadd.f32 %v933_v12, %v887_v18 }
 0x179   : > { %v770_v11 = vrot.slane %v579_v51, 1 }
 0x17a   : > { %v1034_v54 = vrot.slane %v1033_v45, 1  ;;  %v852_v58 = vsel %vm827_vm5, %v849_v55, %v851_v49  ;;  %v935_v15 = vsel %vm910_vm6, %v932_v5, %v934_v62 }
 0x17b   : > { %v888_v2 = vadd.f32 %v852_v58, %v805_v61  ;;  %v771_v20 = vsel %vm744_vm4, %v768_v42, %v770_v11 }
 0x17c   : > { %v1035_v57 = vmax.f32 %v1033_v45, %v1034_v54  ;;  %v806_v28 = vadd.f32 %v771_v20, %v509_v34 }
 0x17d   : > { %v971_v17 = vadd.f32 %v935_v15, %v888_v2 }
 0x17e   : > { %v1065_v47 = vadd.f32 %v1830_v0, %v1035_v57 }
 0x17f   : > { %v647_v3 = vpop.f32.mrf.mxu2  ;;  %v715_v4 = vpop.f32.mrf.mxu3  ;;  %v996_v59 = vsel %vm1810_vm8, %v971_v17, -1e+30 }
 0x180   : > { %v1880_v6 = vpop.f32.mrf.mxu0  ;;  %v582_v7 = vpop.f32.mrf.mxu1  ;;  %v1073_v8 = vmax.f32 %v1065_v47, 0.0  ;;  %v853_v46 = vrot.slane %v647_v3, 2  ;;  %v936_v35 = vrot.slane %v715_v4, 3  ;;  %v1036_v9 = vmax.f32 %v970_v27, %v996_v59 }
 0x181   : > { %v772_v16 = vrot.slane %v582_v7, 1 }
 0x182   : > { %v1114_v60 = vrot.slane %v1073_v8, 4  ;;  %v854_v25 = vsel %vm827_vm5, %v851_v49, %v853_v46  ;;  %v1037_v34 = vrot.slane %v1036_v9, 4 }
 0x183   : > { %v773_v22 = vsel %vm744_vm4, %v770_v11, %v772_v16  ;;  %v889_v13 = vadd.f32 %v854_v25, %v806_v28 }
 0x184   : > { %v1885_v19 = vsel %vm1115_vm12, %v1114_v60, %v1113_v41  ;;  %v807_v36 = vadd.f32 %v773_v22, %v512_v50  ;;  %v937_v41 = vsel %vm910_vm6, %v934_v62, %v936_v35  ;;  %v1038_v52 = vmax.f32 %v1036_v9, %v1037_v34 }
 0x185   : > { %v972_v42 = vadd.f32 %v937_v41, %v889_v13 }
 0x186   : > { %v1039_v58 = vrot.slane %v1038_v52, 2 }
 0x187   : > { %v650_v21 = vpop.f32.mrf.mxu2  ;;  %v718_v26 = vpop.f32.mrf.mxu3 }
 0x188   : > { %v855_v29 = vrot.slane %v650_v21, 2  ;;  %v938_v30 = vrot.slane %v718_v26, 3  ;;  %v518_v31 = vpop.f32.mrf.mxu0  ;;  %v585_v32 = vpop.f32.mrf.mxu1  ;;  %v1040_v10 = vmax.f32 %v1038_v52, %v1039_v58 }
 0x189   : > { %v774_v51 = vrot.slane %v585_v32, 1 }
 0x18a   : > { %v856_v37 = vsel %vm827_vm5, %v853_v46, %v855_v29  ;;  %v939_v39 = vsel %vm910_vm6, %v936_v35, %v938_v30  ;;  %v1041_v18 = vrot.slane %v1040_v10, 1 }
 0x18b   : > { %v890_v38 = vadd.f32 %v856_v37, %v807_v36  ;;  %v775_v57 = vsel %vm744_vm4, %v772_v16, %v774_v51 }
 0x18c   : > { %v808_v3 = vadd.f32 %v775_v57, %v1880_v6  ;;  %v1042_v12 = vmax.f32 %v1040_v10, %v1041_v18 }
 0x18d   : > { %v973_v40 = vadd.f32 %v939_v39, %v890_v38 }
 0x18e   : > { %v1066_v26 = vadd.f32 %v1830_v0, %v1042_v12 }
 0x18f   : > { %v998_v43 = vsel %vm1810_vm8, %v973_v40, -1e+30  ;;  %v653_v44 = vpop.f32.mrf.mxu2  ;;  %v721_v45 = vpop.f32.mrf.mxu3 }
 0x190   : > { %v1043_v48 = vmax.f32 %v972_v42, %v998_v43  ;;  %v521_v49 = vpop.f32.mrf.mxu0  ;;  %v588_v50 = vpop.f32.mrf.mxu1  ;;  %v857_v55 = vrot.slane %v653_v44, 2  ;;  %v940_v7 = vrot.slane %v721_v45, 3 }
 0x191   : > { %v776_v54 = vrot.slane %v588_v50, 1 }
 0x192   : > { %v1044_v53 = vrot.slane %v1043_v48, 4  ;;  %v858_v47 = vsel %vm827_vm5, %v855_v29, %v857_v55  ;;  %v941_v17 = vsel %vm910_vm6, %v938_v30, %v940_v7  ;;  %v1074_v30 = vmax.f32 %v1066_v26, 0.0 }
 0x193   : > { %v777_v61 = vsel %vm744_vm4, %v774_v51, %v776_v54  ;;  %v891_v11 = vadd.f32 %v858_v47, %v808_v3 }
 0x194   : > { %v1045_v56 = vmax.f32 %v1043_v48, %v1044_v53  ;;  %v809_v8 = vadd.f32 %v777_v61, %v518_v31  ;;  %v1117_v33 = vrot.slane %v1074_v30, 3 }
 0x195   : > { %v974_v20 = vadd.f32 %v941_v17, %v891_v11 }
 0x196   : > { %v1046_v62 = vrot.slane %v1045_v56, 2  ;;  %v1119_v9 = vsel %vm1118_vm13, %v1117_v33, %v1885_v19 }
 0x197   : > { %v656_v1 = vpop.f32.mrf.mxu2  ;;  %v724_v2 = vpop.f32.mrf.mxu3 }
 0x198   : > { %v859_v4 = vrot.slane %v656_v1, 2  ;;  %v942_v5 = vrot.slane %v724_v2, 3  ;;  %v1047_v15 = vmax.f32 %v1045_v56, %v1046_v62 }
 0x19a   : > { %v860_v14 = vsel %vm827_vm5, %v857_v55, %v859_v4  ;;  %v943_v60 = vsel %vm910_vm6, %v940_v7, %v942_v5  ;;  %v1048_v22 = vrot.slane %v1047_v15, 1 }
 0x19b   : > { %v892_v16 = vadd.f32 %v860_v14, %v809_v8 }
 0x19c   : > { %v1049_v59 = vmax.f32 %v1047_v15, %v1048_v22 }
 0x19d   : > { %v975_v46 = vadd.f32 %v943_v60, %v892_v16 }
 0x19e   : > { %v1067_v27 = vadd.f32 %v1830_v0, %v1049_v59 }
 0x19f   : > { %v1000_v6 = vsel %vm1810_vm8, %v975_v46, -1e+30 }
 0x1a0   : > { %v1050_v23 = vmax.f32 %v974_v20, %v1000_v6  ;;  %v1075_v31 = vmax.f32 %v1067_v27, 0.0 }
 0x1a2   : > { %v1051_v24 = vrot.slane %v1050_v23, 4  ;;  %v1120_v35 = vrot.slane %v1075_v31, 2 }
 0x1a4   : > { %v1052_v25 = vmax.f32 %v1050_v23, %v1051_v24  ;;  %v1122_v37 = vsel %vm1121_vm14, %v1120_v35, %v1119_v9 }
 0x1a6   : > { %v1053_v21 = vrot.slane %v1052_v25, 2 }
 0x1a8   : > { %v1054_v28 = vmax.f32 %v1052_v25, %v1053_v21 }
 0x1aa   : > { %v1055_v29 = vrot.slane %v1054_v28, 1 }
 0x1ac   : > { %v1056_v32 = vmax.f32 %v1054_v28, %v1055_v29 }
 0x1ae   : > { %v1068_v63 = vadd.f32 %v1830_v0, %v1056_v32  ;;  %v1395_v0 = vld [vmem:[%s1952_s4] ss:$0 sm:$0xff] }
 0x1b0   : > { %v1076_v36 = vmax.f32 %v1068_v63, 0.0 }
 0x1b2   : > { %v1123_v13 = vrot.slane %v1076_v36, 1 }
 0x1b4   : > { %v1125_v38 = vsel %vm1124_vm15, %v1123_v13, %v1122_v37 }
 0x1b5   : > { %1143 = vmatmul.f32.vlgmr.msrb.gmra.mxu0 %v1125_v38 }
 0x232   : > { %v1144_v19 = vpop.f32.mrf.mxu0 }
 0x233   : > { %v1145_v39 = vadd.f32 %v1395_v0, %v1144_v19 }
 0x235   : > { %1147 = vst [vmem:[%s235_s6] sm:$0xff] %v1145_v39 }
 0x236   : > { %1453 = shalt.err (!%p1450_p8)
}
 0x237   : > { %1340 = dma.vmem_to_hbm [thread:$0]  (%p1568_p5), %s1162_s7, 128, %s1164_s8, %s1149_s9  }
 0x238 PF: > { %p1352_p9 = scmp.ge.s32.totalorder %s1492_s21, 2  ;;  %s1175_s13 = sand.u32 1, %s1480_s18  }
 0x239   : > { %s1176_s17 = scalar_lea.sflag [#allocation4], %s1175_s13 }
 0x23a   : > { %p1347_p10 = pnand %p1352_p9, %p1572_p6 }
 0x23c   : > { %p1348_p11 = pneg %p1347_p10 }
 0x23e   : > { %1475 = dma.done.wait (%p1348_p11), %s1176_s17, 128  }
 0x23f   : > { %1477 = vsyncadd (%p1348_p11), %s1176_s17, 4294967168  ;;  %p16_p12 = scmp.ge.s32.totalorder %s1555_s24, 4   ;;  %s1958_s18 = smov %s1484_s19 }
 0x240   : > { %s1959_s19 = smov %s1488_s20  ;;  %s1960_s20 = smov %s1566_s27 }
 0x241   : > { %s1961_s21 = smov %s1555_s24  ;;  %18 = sbr.rel (!%p16_p12) target bundleno = 4 (0x4), region = 80 }
 0x246   :  { %1182 = vsyncpa [#allocation3], 1 }
 0x247   :  { %1184 = vsyncpa [#allocation3 + $0x1], 1 }
 0x248   :  { %1185 = vsyncpa [#allocation4], 1 }
 0x249   :  { %1187 = vsyncpa [#allocation4 + $0x1], 1 }

</bundles_post_ra>
